<compile_context>
chip_gen: v7x
topology: tpu7x:2x2x1
jax: 0.10.0
libtpu: 0.0.40
codegen_flags: <defaults>
</compile_context>

<pallas_src>
import jax
import jax.numpy as jnp
from jax.experimental import pallas as pl
from jax.experimental.pallas import tpu as pltpu


_NORM_EPS_SQ = 1e-24      # matches torch F.normalize(eps=1e-12) clamp on the norm
_VMEM_LIMIT = 32 * 1024 * 1024   # explicit scoped-VMEM limit (safe on v5e/v6e/v7x)
_TILE_BUDGET = 24 * 1024 * 1024  # cap: 2x(in+out) per grid step stays well under VMEM


def _round_up(x, m):
    return (x + m - 1) // m * m


def _choose_row_tile(n8, bytes_per_row):
    """Largest row tile (multiple of 8) dividing n8 that fits the VMEM budget.

    Prefers a tile that yields >= 2 grid steps so the 'parallel' row axis can
    shard across both TensorCores on v7x (no-op on single-TC v5e/v6e).
    """
    cands = [t for t in (4096, 2048, 1024, 512, 256, 128, 64, 32, 16, 8)
             if n8 % t == 0 and 2 * t * bytes_per_row <= _TILE_BUDGET]
    if not cands:
        return 8  # n8 is always a multiple of 8 by construction
    multi = [t for t in cands if n8 // t >= 2]
    return multi[0] if multi else cands[0]


def _pad_rows(a, n8):
    n = a.shape[0]
    if n8 == n:
        return a
    return jnp.pad(a, ((0, n8 - n), (0, 0)))


# ---------------------------------------------------------------------------
# Pallas kernels
# ---------------------------------------------------------------------------

def _embed_only_kernel(x_ref, w_ref, b_ref, av_ref, feat_ref, attn_ref):
    """patch-embed + attention-logit matvec (forward/inference path: NO scores).

    x_ref : (TN, K)  bf16 raw patch pixels
    w_ref : (K, D)   bf16 embed weight (true width)
    b_ref : (1, D)   f32 embed bias
    av_ref: (1, D)   f32 attention vector (stand-in attn logits)
    feat_ref: (TN, D) f32 features
    attn_ref: (TN, 1) f32 attention logits
    """
    f = (jnp.dot(x_ref[...], w_ref[...], preferred_element_type=jnp.float32)
         + b_ref[...])
    feat_ref[...] = f.astype(feat_ref.dtype)
    attn_ref[...] = jnp.sum(f * av_ref[...], axis=-1, keepdims=True).astype(
        attn_ref.dtype)


def _fused_embed_similarity_kernel(x_ref, w_ref, b_ref, av_ref, pt_ref,
                                   feat_ref, attn_ref, scores_ref):
    """patch-embed -> attn logits -> L2 normalize -> prototype similarity.

    pt_ref: (D, P) bf16 prototypes (pre-transposed at init).
    Normalize math stays f32 (v5e has no bf16 VPU/EUP); only MXU operands are bf16.
    """
    f = (jnp.dot(x_ref[...], w_ref[...], preferred_element_type=jnp.float32)
         + b_ref[...])
    feat_ref[...] = f.astype(feat_ref.dtype)
    attn_ref[...] = jnp.sum(f * av_ref[...], axis=-1, keepdims=True).astype(
        attn_ref.dtype)
    # F.normalize(x, dim=-1, p=2): clamp ||x|| at 1e-12  <=>  sumsq at 1e-24.
    sumsq = jnp.sum(f * f, axis=-1, keepdims=True)
    f_n = f * jax.lax.rsqrt(jnp.maximum(sumsq, _NORM_EPS_SQ))
    scores_ref[...] = jnp.dot(
        f_n.astype(jnp.bfloat16), pt_ref[...],
        preferred_element_type=jnp.float32).astype(scores_ref.dtype)


def _similarity_kernel(f_ref, pt_ref, o_ref):
    # TimeT.get_feature_prototype_similarity for arbitrary feature inputs:
    #   scores = F.normalize(x, dim=-1, p=2) @ prototypes.T
    f = f_ref[...].astype(jnp.float32)
    sumsq = jnp.sum(f * f, axis=-1, keepdims=True)
    f_n = f * jax.lax.rsqrt(jnp.maximum(sumsq, _NORM_EPS_SQ))
    o_ref[...] = jnp.dot(
        f_n.astype(jnp.bfloat16), pt_ref[...],
        preferred_element_type=jnp.float32).astype(o_ref.dtype)


# ---------------------------------------------------------------------------
# pallas_call wrappers
# ---------------------------------------------------------------------------

_CPARAMS = pltpu.CompilerParams(dimension_semantics=("parallel",),
                                vmem_limit_bytes=_VMEM_LIMIT)


def _embed_only(patches_bf16, w, b, av):
    n, k = patches_bf16.shape
    d = w.shape[1]
    n8 = _round_up(n, 8)
    x = _pad_rows(patches_bf16, n8)
    bytes_per_row = k * 2 + d * 4 + 4
    tn = _choose_row_tile(n8, bytes_per_row)
    feat, attn = pl.pallas_call(
        _embed_only_kernel,
        out_shape=(jax.ShapeDtypeStruct((n8, d), jnp.float32),
                   jax.ShapeDtypeStruct((n8, 1), jnp.float32)),
        grid=(n8 // tn,),
        in_specs=[
            pl.BlockSpec((tn, k), lambda i: (i, 0)),
            pl.BlockSpec((k, d), lambda i: (0, 0)),
            pl.BlockSpec((1, d), lambda i: (0, 0)),
            pl.BlockSpec((1, d), lambda i: (0, 0)),
        ],
        out_specs=(
            pl.BlockSpec((tn, d), lambda i: (i, 0)),
            pl.BlockSpec((tn, 1), lambda i: (i, 0)),
        ),
        compiler_params=_CPARAMS,
    )(x, w, b, av)
    if n8 != n:
        feat, attn = feat[:n], attn[:n]
    return feat, attn


def _fused_embed_similarity(patches_bf16, w, b, av, pt):
    n, k = patches_bf16.shape
    d = w.shape[1]
    p = pt.shape[1]
    n8 = _round_up(n, 8)
    x = _pad_rows(patches_bf16, n8)
    bytes_per_row = k * 2 + d * 4 + p * 4 + 4
    tn = _choose_row_tile(n8, bytes_per_row)
    feat, attn, scores = pl.pallas_call(
        _fused_embed_similarity_kernel,
        out_shape=(jax.ShapeDtypeStruct((n8, d), jnp.float32),
                   jax.ShapeDtypeStruct((n8, 1), jnp.float32),
                   jax.ShapeDtypeStruct((n8, p), jnp.float32)),
        grid=(n8 // tn,),
        in_specs=[
            pl.BlockSpec((tn, k), lambda i: (i, 0)),
            pl.BlockSpec((k, d), lambda i: (0, 0)),
            pl.BlockSpec((1, d), lambda i: (0, 0)),
            pl.BlockSpec((1, d), lambda i: (0, 0)),
            pl.BlockSpec((d, p), lambda i: (0, 0)),
        ],
        out_specs=(
            pl.BlockSpec((tn, d), lambda i: (i, 0)),
            pl.BlockSpec((tn, 1), lambda i: (i, 0)),
            pl.BlockSpec((tn, p), lambda i: (i, 0)),
        ),
        compiler_params=_CPARAMS,
    )(x, w, b, av, pt)
    if n8 != n:
        feat, attn, scores = feat[:n], attn[:n], scores[:n]
    return feat, attn, scores


def _prototype_similarity(features_flat, pt):
    n, d = features_flat.shape
    p = pt.shape[1]
    n8 = _round_up(n, 8)
    x = _pad_rows(features_flat, n8)
    bytes_per_row = d * 4 + p * 4
    tn = _choose_row_tile(n8, bytes_per_row)
    scores = pl.pallas_call(
        _similarity_kernel,
        out_shape=jax.ShapeDtypeStruct((n8, p), jnp.float32),
        grid=(n8 // tn,),
        in_specs=[
            pl.BlockSpec((tn, d), lambda i: (i, 0)),
            pl.BlockSpec((d, p), lambda i: (0, 0)),
        ],
        out_specs=pl.BlockSpec((tn, p), lambda i: (i, 0)),
        compiler_params=_CPARAMS,
    )(x, pt)
    if n8 != n:
        scores = scores[:n]
    return scores


# ---------------------------------------------------------------------------
# TimeT (inference forward) in JAX + Pallas
# ---------------------------------------------------------------------------

class TimeTPallas:
    """Re-implementation of TimeT's forward (train=False) path.

    The feature_extractor dependency is not defined in the reference module, so
    a ViT-style linear patch-embedding stand-in is used. Its matmul, the
    attention-logit matvec and TimeT's prototype-similarity (normalize + matmul
    against prototypes.T) run fused inside Pallas; the inference forward() path
    uses an embed-only kernel so no scores bytes are written and discarded.
    """

    def __init__(self, key, *, in_channels=4, patch=4, feature_dim=32,
                 prototype_number=10):
        self.patch = patch
        self.feature_dim = feature_dim
        self.prototype_number = prototype_number
        k_w, k_b, k_a, k_p = jax.random.split(key, 4)
        kdim = in_channels * patch * patch

        w = jax.random.normal(k_w, (kdim, feature_dim), jnp.float32) * 0.02
        b = jax.random.normal(k_b, (feature_dim,), jnp.float32) * 0.02
        # MXU operands stored as bf16 (halves their DMA bytes, bf16 MXU peak on
        # v6e/v7x); bias / attn vector stay f32 (added / reduced on the VPU).
        self.embed_w = w.astype(jnp.bfloat16)
        self.embed_b = b.reshape(1, feature_dim)
        self.attn_vec = jax.random.normal(
            k_a, (1, feature_dim), jnp.float32)

        # TimeT prototypes: randn then L2-normalize along dim=-1 (as __init__).
        proto = jax.random.normal(k_p, (prototype_number, feature_dim),
                                  jnp.float32)
        proto = proto * jax.lax.rsqrt(
            jnp.maximum(jnp.sum(proto * proto, axis=-1, keepdims=True),
                        _NORM_EPS_SQ))
        self.prototypes = proto                                   # canonical (P, D)
        self.proto_t = proto.T.astype(jnp.bfloat16)               # (D, P) for MXU

    # -- feature extractor stand-in -----------------------------------------
    def _extract_patches(self, x):
        # x: [B, C, H, W] (NCHW) -> [B*num_patches, C*P*P] in bf16 so the
        # kernel's input DMA is half-width.
        # TODO(synk): fold patch extraction into the kernel (grid over
        # (b, hp, wp) with an index_map into x, or accept NHWC input) to avoid
        # materializing this transposed copy in HBM.
        b, c, h, w = x.shape
        p = self.patch
        xp = x.reshape(b, c, h // p, p, w // p, p)
        xp = jnp.transpose(xp, (0, 2, 4, 1, 3, 5))  # [B, Hp, Wp, C, p, p]
        patches = xp.reshape(b * (h // p) * (w // p), c * p * p)
        return patches.astype(jnp.bfloat16), (h // p) * (w // p)

    def forward_with_scores(self, x, use_head=True):
        # Single fused Pallas kernel: embed -> attn logits -> normalize ->
        # prototype scores (all outputs true-width: no post-kernel lane slices).
        b = x.shape[0]
        patches, num_patches = self._extract_patches(x)
        feat, attn_logits, scores = _fused_embed_similarity(
            patches, self.embed_w, self.embed_b, self.attn_vec, self.proto_t)
        features = feat.reshape(b, num_patches, self.feature_dim)
        # TODO(synk): real feature_extractor attention maps (ViT attn) are
        # architecture-specific; softmax-over-patches stand-in on the in-kernel
        # logits.
        attentions = jax.nn.softmax(
            attn_logits.reshape(b, num_patches), axis=-1)
        return features, attentions, scores

    def feature_extractor(self, x, use_head=True):
        # Inference path: embed-only kernel (no prototype-score writeback).
        b = x.shape[0]
        patches, num_patches = self._extract_patches(x)
        feat, attn_logits = _embed_only(
            patches, self.embed_w, self.embed_b, self.attn_vec)
        features = feat.reshape(b, num_patches, self.feature_dim)
        attentions = jax.nn.softmax(
            attn_logits.reshape(b, num_patches), axis=-1)
        return features, attentions

    # -- TimeT compute -------------------------------------------------------
    def get_feature_prototype_similarity(self, x_flat):
        # x_flat: [N, dim] -> scores [N, prototype_number]
        return _prototype_similarity(x_flat, self.proto_t)

    def forward(self, x, annotations=None, train=False, mask_features=False,
                use_head=True):
        # Inference path of TimeT.forward (train=False): returns
        # (features [B, num_patches, dim], attentions).
        features, attentions = self.feature_extractor(x, use_head=use_head)
        return features, attentions


# ---------------------------------------------------------------------------
# Main
# ---------------------------------------------------------------------------

if __name__ == "__main__":
    key = jax.random.PRNGKey(0)
    k_model, k_x = jax.random.split(key)

    B, C, H, W = 2, 4, 16, 16
    model = TimeTPallas(k_model, in_channels=C, patch=4, feature_dim=32,
                        prototype_number=10)

    x = jax.random.normal(k_x, (B, C, H, W), jnp.float32)

    # Fused path: one Pallas launch produces features, attn logits and scores.
    features, attentions, scores = model.forward_with_scores(x)
    features, attentions, scores = jax.block_until_ready(
        (features, attentions, scores))

    # Spec-faithful forward API (train=False) -> (features, attentions); uses
    # the embed-only kernel (no scores written / discarded).
    f2, a2 = jax.block_until_ready(model.forward(x, train=False))

    # Standalone get_feature_prototype_similarity path; must match fused scores.
    bs, num_patches, dim = features.shape
    scores_standalone = model.get_feature_prototype_similarity(
        features.reshape(bs * num_patches, dim))
    scores_standalone = jax.block_until_ready(scores_standalone)

    assert features.shape == (B, (H // 4) * (W // 4), 32)
    assert f2.shape == features.shape
    assert attentions.shape == (B, (H // 4) * (W // 4))
    assert scores.shape == (B * (H // 4) * (W // 4), 10)
    assert jnp.allclose(features, f2, atol=1e-5)
    # bf16 MXU operands: tolerance covers bf16 rounding of the normalized feats.
    assert jnp.allclose(scores, scores_standalone, atol=1e-3)
    print("KERNEL_OK")
</pallas_src>

<mosaic_0001>
module attributes {stable_mosaic.version = 11 : i64} {
  func.func @_fused_embed_similarity_kernel(%arg0: i32, %arg1: memref<16x64xbf16, #tpu.memory_space<vmem>>, %arg2: memref<64x32xbf16, #tpu.memory_space<vmem>>, %arg3: memref<1x32xf32, #tpu.memory_space<vmem>>, %arg4: memref<1x32xf32, #tpu.memory_space<vmem>>, %arg5: memref<32x10xbf16, #tpu.memory_space<vmem>>, %arg6: memref<16x32xf32, #tpu.memory_space<vmem>>, %arg7: memref<16x1xf32, #tpu.memory_space<vmem>>, %arg8: memref<16x10xf32, #tpu.memory_space<vmem>>) attributes {dimension_semantics = [#tpu.dimension_semantics<parallel>], iteration_bounds = array<i64: 2>, scalar_prefetch = 0 : i64, scratch_operands = 0 : i64, tpu.core_type = #tpu.core_type<tc>, window_params = [{transform_indices = @transform_0, window_bounds = array<i64: 16, 64>}, {pipeline_mode = #tpu.pipeline_mode<synchronous>, transform_indices = @transform_1, window_bounds = array<i64: 64, 32>}, {pipeline_mode = #tpu.pipeline_mode<synchronous>, transform_indices = @transform_2, window_bounds = array<i64: 1, 32>}, {pipeline_mode = #tpu.pipeline_mode<synchronous>, transform_indices = @transform_3, window_bounds = array<i64: 1, 32>}, {pipeline_mode = #tpu.pipeline_mode<synchronous>, transform_indices = @transform_4, window_bounds = array<i64: 32, 10>}, {transform_indices = @transform_5, window_bounds = array<i64: 16, 32>}, {transform_indices = @transform_6, window_bounds = array<i64: 16, 1>}, {transform_indices = @transform_7, window_bounds = array<i64: 16, 10>}]} {
    %c0 = arith.constant 0 : index
    %c0_0 = arith.constant 0 : index
    %0 = vector.load %arg1[%c0, %c0_0] : memref<16x64xbf16, #tpu.memory_space<vmem>>, vector<16x64xbf16>
    %c0_1 = arith.constant 0 : index
    %c0_2 = arith.constant 0 : index
    %1 = vector.load %arg2[%c0_1, %c0_2] : memref<64x32xbf16, #tpu.memory_space<vmem>>, vector<64x32xbf16>
    %cst = arith.constant dense<0.000000e+00> : vector<16x32xf32>
    %2 = tpu.matmul %0, %1, %cst {dimension_numbers = #tpu.dot_dimension_numbers<[1], [0], [0], [1], [0, 0, 1, 1], [], []>} : vector<16x64xbf16>, vector<64x32xbf16>, vector<16x32xf32> -> vector<16x32xf32>
    %c0_3 = arith.constant 0 : index
    %c0_4 = arith.constant 0 : index
    %3 = vector.load %arg3[%c0_3, %c0_4] : memref<1x32xf32, #tpu.memory_space<vmem>>, vector<1x32xf32>
    %4 = vector.broadcast %3 : vector<1x32xf32> to vector<16x32xf32>
    %5 = arith.addf %2, %4 : vector<16x32xf32>
    %c0_5 = arith.constant 0 : index
    %c0_6 = arith.constant 0 : index
    %6 = vector.load %arg6[%c0_5, %c0_6] : memref<16x32xf32, #tpu.memory_space<vmem>>, vector<16x32xf32>
    tpu.vector_store %arg6[%c0_5, %c0_6], %5 {strides = array<i32>} : memref<16x32xf32, #tpu.memory_space<vmem>>, vector<16x32xf32>,
    %c0_7 = arith.constant 0 : index
    %c0_8 = arith.constant 0 : index
    %7 = vector.load %arg4[%c0_7, %c0_8] : memref<1x32xf32, #tpu.memory_space<vmem>>, vector<1x32xf32>
    %8 = vector.broadcast %7 : vector<1x32xf32> to vector<16x32xf32>
    %9 = arith.mulf %5, %8 : vector<16x32xf32>
    %cst_9 = arith.constant dense<0.000000e+00> : vector<16xf32>
    %10 = vector.multi_reduction <add>, %9, %cst_9 [1] : vector<16x32xf32> to vector<16xf32>
    %11 = vector.shape_cast %10 : vector<16xf32> to vector<16x1xf32>
    %c0_10 = arith.constant 0 : index
    %c0_11 = arith.constant 0 : index
    %12 = vector.load %arg7[%c0_10, %c0_11] : memref<16x1xf32, #tpu.memory_space<vmem>>, vector<16x1xf32>
    tpu.vector_store %arg7[%c0_10, %c0_11], %11 {strides = array<i32>} : memref<16x1xf32, #tpu.memory_space<vmem>>, vector<16x1xf32>,
    %13 = arith.mulf %5, %5 : vector<16x32xf32>
    %cst_12 = arith.constant dense<0.000000e+00> : vector<16xf32>
    %14 = vector.multi_reduction <add>, %13, %cst_12 [1] : vector<16x32xf32> to vector<16xf32>
    %15 = vector.shape_cast %14 : vector<16xf32> to vector<16x1xf32>
    %cst_13 = arith.constant 1.000000e-24 : f32
    %16 = vector.broadcast %cst_13 : f32 to vector<16x1xf32>
    %17 = arith.maximumf %15, %16 : vector<16x1xf32>
    %18 = math.rsqrt %17 : vector<16x1xf32>
    %19 = vector.broadcast %18 : vector<16x1xf32> to vector<16x32xf32>
    %20 = arith.mulf %5, %19 : vector<16x32xf32>
    %21 = arith.truncf %20 : vector<16x32xf32> to vector<16x32xbf16>
    %c0_14 = arith.constant 0 : index
    %c0_15 = arith.constant 0 : index
    %22 = vector.load %arg5[%c0_14, %c0_15] : memref<32x10xbf16, #tpu.memory_space<vmem>>, vector<32x10xbf16>
    %cst_16 = arith.constant dense<0.000000e+00> : vector<16x10xf32>
    %23 = tpu.matmul %21, %22, %cst_16 {dimension_numbers = #tpu.dot_dimension_numbers<[1], [0], [0], [1], [0, 0, 1, 1], [], []>} : vector<16x32xbf16>, vector<32x10xbf16>, vector<16x10xf32> -> vector<16x10xf32>
    %c0_17 = arith.constant 0 : index
    %c0_18 = arith.constant 0 : index
    %24 = vector.load %arg8[%c0_17, %c0_18] : memref<16x10xf32, #tpu.memory_space<vmem>>, vector<16x10xf32>
    tpu.vector_store %arg8[%c0_17, %c0_18], %23 {strides = array<i32>} : memref<16x10xf32, #tpu.memory_space<vmem>>, vector<16x10xf32>,
    return
  }
  func.func @transform_0(%arg0: i32) -> (i32, i32) {
    %c0_i32 = arith.constant 0 : i32
    %c0_i32_0 = arith.constant 0 : i32
    return %arg0, %c0_i32 : i32, i32
  }
  func.func @transform_1(%arg0: i32) -> (i32, i32) {
    %c0_i32 = arith.constant 0 : i32
    %c0_i32_0 = arith.constant 0 : i32
    %c0_i32_1 = arith.constant 0 : i32
    return %c0_i32, %c0_i32_0 : i32, i32
  }
  func.func @transform_2(%arg0: i32) -> (i32, i32) {
    %c0_i32 = arith.constant 0 : i32
    %c0_i32_0 = arith.constant 0 : i32
    %c0_i32_1 = arith.constant 0 : i32
    return %c0_i32, %c0_i32_0 : i32, i32
  }
  func.func @transform_3(%arg0: i32) -> (i32, i32) {
    %c0_i32 = arith.constant 0 : i32
    %c0_i32_0 = arith.constant 0 : i32
    %c0_i32_1 = arith.constant 0 : i32
    return %c0_i32, %c0_i32_0 : i32, i32
  }
  func.func @transform_4(%arg0: i32) -> (i32, i32) {
    %c0_i32 = arith.constant 0 : i32
    %c0_i32_0 = arith.constant 0 : i32
    %c0_i32_1 = arith.constant 0 : i32
    return %c0_i32, %c0_i32_0 : i32, i32
  }
  func.func @transform_5(%arg0: i32) -> (i32, i32) {
    %c0_i32 = arith.constant 0 : i32
    %c0_i32_0 = arith.constant 0 : i32
    return %arg0, %c0_i32 : i32, i32
  }
  func.func @transform_6(%arg0: i32) -> (i32, i32) {
    %c0_i32 = arith.constant 0 : i32
    %c0_i32_0 = arith.constant 0 : i32
    return %arg0, %c0_i32 : i32, i32
  }
  func.func @transform_7(%arg0: i32) -> (i32, i32) {
    %c0_i32 = arith.constant 0 : i32
    %c0_i32_0 = arith.constant 0 : i32
    return %arg0, %c0_i32 : i32, i32
  }
}

</mosaic_0001>

<bundles_post_ra>
// kernel: tpu_custom_call.1
= control target key start
LH: loop header
LB: loop body
LE: loop exit
PB: predicated region body
PF: predicated region fallthrough
CT: control target
= control target key end

     0   :  { %13 = vsyncpa [#allocation3], 0  ;;  %s1017_s0 = inlined_call_operand.vmem [shape: bf16[32,64], index: 0, kind: input, shape index: {}]   ;;  %s1018_s1 = inlined_call_operand.vmem [shape: bf16[64,32], index: 1, kind: input, shape index: {}]   ;;  %s1019_s2 = inlined_call_operand.vmem [shape: f32[1,32], index: 2, kind: input, shape index: {}]   ;;  %s1020_s3 = inlined_call_operand.vmem [shape: f32[1,32], index: 3, kind: input, shape index: {}]   ;;  %s1021_s4 = inlined_call_operand.vmem [shape: bf16[32,10], index: 4, kind: input, shape index: {}]   ;;  %s1022_s5 = inlined_call_operand.hbm [shape: f32[32,32], index: 5, kind: output, shape index: {0}]   ;;  %s1023_s6 = inlined_call_operand.vmem [shape: f32[32,1], index: 6, kind: output, shape index: {1}]   ;;  %s1024_s7 = inlined_call_operand.vmem [shape: f32[32,10], index: 7, kind: output, shape index: {2}]  }
   0x1   :  { %15 = vsyncpa [#allocation3 + $0x1], 0  ;;  %s861_s24 = smov 0   ;;  %s863_s25 = smov 0  }
   0x2   :  { %s865_s26 = smov 0   ;;  %s867_s27 = smov 0  }
   0x3 LB: > { %s882_s28 = sadd.s32 4294967295, %s814_s27   ;;  %s642_s29 = sadd.s32 4294967294, %s814_s27   ;;  %s814_s27 = sphi %s867_s27, %s1030_s27   ;;  %s810_s26 = sphi %s865_s26, %s1029_s26   ;;  %s806_s25 = sphi %s863_s25, %s1028_s25   ;;  %s802_s24 = sphi %s861_s24, %s1027_s24  }
   0x4   : > { %s886_s30 = sadd.s32 1, %s814_s27   ;;  %s138_s8 = sadd.s32 1, %s810_s26 }
   0x5   : > { %s135_s9 = ssub.s32 %s814_s27, %s886_s30  ;;  %p148_p0 = scmp.ne.s32.totalorder %s810_s26, %s806_s25 }
   0x6   : > { %p136_p1 = scmp.eq.s32.totalorder %s135_s9, 0  ;;  %p149_p2 = scmp.eq.s32.totalorder %s882_s28, 1 }
   0x7   : > { %p154_p3 = scmp.ne.s32.totalorder %s806_s25, %s802_s24  ;;  %p155_p4 = scmp.eq.s32.totalorder %s642_s29, 1 }
   0x8   : > { %s897_s10 = scalar_select %p136_p1, %s810_s26, %s138_s8  }
   0x9   : > { %p899_p5 = por %p149_p2, %p148_p0  ;;  %p903_p6 = por %p155_p4, %p154_p3 }
   0xa   : > { %p645_p7 = scmp.ge.s32.totalorder %s814_s27, 1  ;;  %p246_p8 = scmp.lt.s32.totalorder %s814_s27, 3 }
   0xc   : > { %p247_p9 = pnand %p645_p7, %p246_p8 }
   0xd   : > { %v741_v0 = vld [vmem:[%s1018_s1] sm:$0xff] (!%p247_p9)   ;;  %v816_v1 = vmov (!%p247_p9), 0.0   ;;  %v742_v2 = vld [vmem:[%s1018_s1 + $0x8] sm:$0xff] (!%p247_p9)   ;;  %vm817_vm0 = vmmov (!%p247_p9), 0   ;;  %s647_s17 = sshll.u32 (!%p247_p9), %s882_s28, 1  ;;  %v743_v3 = vld [vmem:[%s1018_s1 + $0x10] sm:$0xff] (!%p247_p9)  }
   0xe   : > { %250 = sbr.rel (%p247_p9) target bundleno = 625 (0x271), region = 40  ;;  %678 = vmatprep.subr.bf16.mxu0 (!%p247_p9), %v816_v1  ;;  %690 = vmatprep.subr.bf16.mxu1 (!%p247_p9), %v816_v1  ;;  %p289_p10 = scmp.lt.s32.totalorder (!%p247_p9), %s647_s17, 3  ;;  %v744_v4 = vld [vmem:[%s1018_s1 + $0x18] sm:$0xff] (!%p247_p9)   ;;  %vm354_vm1 = vcmask (!%p247_p9), 523264   ;;  %v653_v6 = vld [vmem:[%s1019_s2] ss:$0 sm:$0xff] (!%p247_p9) }
   0xf   : > { %679 = vmatpush3.bf16.msra.mxu0 (!%p247_p9), %v741_v0  ;;  %686 = vmatprep.mubr.msk.bf16.mxu0 (!%p247_p9), %vm817_vm0, %v816_v1  ;;  %s271_s9 = sand.u32 (!%p247_p9), 1, %s806_s25   ;;  %vm399_vm2 = vcmask (!%p247_p9), 261120   ;;  %v660_v8 = vld [vmem:[%s1020_s3] ss:$0 sm:$0xff] (!%p247_p9)  ;;  %v747_v23 = vld [vmem:[%s1021_s4 + $0x8] sm:$0xff] (!%p247_p9)   ;;  %vm417_vm3 = vcmask (!%p247_p9), 7168  }
  0x10   : > { %680 = vmatprep.subr.bf16.mxu0 (!%p247_p9), %v816_v1  ;;  %694 = vmatprep.mubr.msk.bf16.mxu1 (!%p247_p9), %vm817_vm0, %v816_v1  ;;  %s646_s13 = sshll.u32 (!%p247_p9), %s271_s9, 4  ;;  %v746_v22 = vld [vmem:[%s1021_s4] sm:$0xff] (!%p247_p9)   ;;  %s669_s15 = sshll.u32 (!%p247_p9), %s882_s28, 8 }
  0x11   : > { %s937_s19 = scalar_lea.vmem (!%p247_p9), [#allocation2], %s646_s13  ;;  %691 = vmatpush3.bf16.msra.mxu1 (!%p247_p9), %v746_v22  ;;  %s965_s21 = scalar_lea.hbm (!%p247_p9), %s1022_s5, %s669_s15 }
  0x12   : > { %692 = vmatprep.subr.bf16.mxu1 (!%p247_p9), %v816_v1  ;;  %s522_s16 = sshll.u32 (!%p247_p9), %s937_s19, 4  ;;  %s971_s22 = scalar_lea.sflag (!%p247_p9), [#allocation3], %s271_s9  ;;  %s967_s16 = int_to_ptr.vmem [resolvable:$true] %s522_s16 }
  0x13   : > { %681 = vmatpush3.bf16.msra.mxu0 (!%p247_p9), %v742_v2  ;;  %s818_s28 = smov (!%p247_p9), [#allocation2]  }
  0x14   : > { %682 = vmatprep.subr.bf16.mxu0 (!%p247_p9), %v816_v1 }
  0x15   : > { %s1032_s17 = smov (!%p289_p10, %s647_s17), 3  ;;  %693 = vmatpush3.bf16.msra.mxu1 %v747_v23 }
  0x16   : > { %s648_s20 = sshll.u32 %s1032_s17, 2  ;;  %s650_s29 = sshll.u32 %s1032_s17, 3 }
  0x17   : > { %s292_s23 = scalar_lea.vmem %s1017_s0, %s648_s20  ;;  %683 = vmatpush3.bf16.msra.mxu0 %v743_v3  ;;  %s299_s14 = scalar_lea.vmem %s1023_s6, %s650_s29 }
  0x18   : > { %684 = vmatprep.subr.bf16.mxu0 %v816_v1  ;;  %v745_v5 = vld [vmem:[%s292_s23] sm:$0xff]   ;;  %s752_s23 = scalar_lea.vmem %s967_s16, 256 }
  0x19   : > { %p753_p11 = scmp.ne.s32.totalorder %s967_s16, %s752_s23 }
  0x1b   : > { %685 = vmatpush3.bf16.msra.mxu0 %v744_v4  ;;  %p754_p12 = pnand %p753_p11, %p899_p5 }
  0x1d   : > { %p755_p13 = pneg %p754_p12 }
  0x1e   : > { %687 = vmatmul.mubr.msk.bf16.vlgmr.msra.gmra.mrb[0].mxu0 %vm354_vm1, %v745_v5 }
  0xf1   : > { %v392_v7 = vpop.f32.mrb[0].mxu0 }
  0xf2   : > { %v393_v9 = vadd.f32 %v653_v6, %v392_v7  ;;  %v688_v10 = vpop.f32.mrb[1].mxu0 }
  0xf3   : > { %v395_v11 = vpop.f32.mrb[2].mxu0 }
  0xf4   : > { %400 = vst.msk [vmem:[%s937_s19] sm:$0xff] %vm399_vm2, %v393_v9  ;;  %v396_v12 = vadd.f32 %v653_v6, %v395_v11  ;;  %v689_v13 = vpop.f32.mrb[3].mxu0  ;;  %v420_v14 = vmul.f32 %v393_v9, %v393_v9  ;;  %v409_v15 = vmul.f32 %v660_v8, %v393_v9 }
  0xf6   : > { %401 = vst.msk [vmem:[%s937_s19 + $0x8] sm:$0xff] %vm399_vm2, %v396_v12  ;;  %v422_v16 = vsel %vm399_vm2, %v420_v14, 0.0  ;;  %v411_v17 = vsel %vm399_vm2, %v409_v15, 0.0  ;;  %v421_v18 = vmul.f32 %v396_v12, %v396_v12  ;;  %v410_v19 = vmul.f32 %v660_v8, %v396_v12  ;;  %s756_s19 = sshll.u32 %s818_s28, 4  ;;  %s757_s19 = int_to_ptr.vmem [resolvable:$false] %s756_s19 }
  0xf7   : > { %423 = vadd.xlane.f32.xlu0 %v422_v16  ;;  %412 = vadd.xlane.f32.xlu1 %v411_v17  ;;  %s758_s8 = scalar_lea.vmem %s757_s19, 512  ;;  %p759_p0 = scmp.lt.s32.totalorder %s967_s16, %s757_s19 }
  0xf8   : > { %v425_v20 = vsel %vm399_vm2, %v421_v18, 0.0  ;;  %v414_v21 = vsel %vm399_vm2, %v410_v19, 0.0  ;;  %p760_p1 = scmp.lt.s32.totalorder %s758_s8, %s752_s23 }
  0xfa   : > { %p761_p2 = por %p760_p1, %p759_p0 }
  0xfb   : > { %426 = vadd.xlane.f32.xlu0 %v425_v20  ;;  %415 = vadd.xlane.f32.xlu1 %v414_v21 }
  0xfc   : > { %p762_p3 = pnand %p761_p2, %p755_p13 }
 0x184   : > { %v424_v24 = vpop.xlane.xlu0 %423  ;;  %v413_v25 = vpop.xlane.xlu1 %412 }
 0x185   : > { %v428_v26 = vmax.f32 %v424_v24, 1e-24  ;;  %418 = vst.msk [vmem:[%s299_s14] sm:$0xff] %vm417_vm3, %v413_v25 }
 0x187   : > { %748 = vrsqrt.f32 %v428_v26 }
 0x188   : > { %v427_v27 = vpop.xlane.xlu0 %426  ;;  %v416_v28 = vpop.xlane.xlu1 %415 }
 0x189   : > { %v429_v29 = vmax.f32 %v427_v27, 1e-24  ;;  %419 = vst.msk [vmem:[%s299_s14 + $0x8] sm:$0xff] %vm417_vm3, %v416_v28 }
 0x18b   : > { %750 = vrsqrt.f32 %v429_v29 }
 0x191   : > { %v749_v30 = vpop.eup %748 }
 0x192   : > { %v432_v32 = vmul.f32 %v749_v30, %v393_v9 }
 0x195   : > { %v751_v31 = vpop.eup %750 }
 0x196   : > { %v433_v33 = vmul.f32 %v751_v31, %v396_v12 }
 0x198   : > { %v434_v34 = vpack.c.bf16 %v433_v33, %v432_v32 }
 0x19a   : > { %695 = vmatmul.mubr.msk.bf16.vlgmr.msra.gmra.mrb[0].mxu1 %vm399_vm2, %v434_v34 }
 0x19b   : > { %765 = shalt.err (!%p762_p3)
}
 0x19c   : > { %s766_s9 = scalar_lea.hbm %s965_s21, 256  ;;  %s770_s15 = scalar_lea.hbm %s1022_s5, 512 }
 0x19d   : > { %p767_p4 = scmp.ne.s32.totalorder %s965_s21, %s766_s9  ;;  %p771_p9 = scmp.lt.u32.totalorder %s965_s21, %s1022_s5 }
 0x19e   : > { %p772_p10 = scmp.lt.u32.totalorder %s770_s15, %s766_s9  ;;  %p774_p12 = scmp.lt.u32.totalorder %s766_s9, %s965_s21 }
 0x19f   : > { %p768_p7 = pnand %p767_p4, %p899_p5 }
 0x1a0   : > { %p773_p11 = por %p772_p10, %p771_p9 }
 0x1a1   : > { %p769_p8 = pneg %p768_p7 }
 0x1a2   : > { %p775_p13 = por %p774_p12, %p773_p11 }
 0x1a4   : > { %p776_p0 = pnand %p775_p13, %p769_p8 }
 0x1a6   : > { %779 = shalt.err (!%p776_p0)
}
 0x1a7   : > { %s819_s23 = smov 128   ;;  %s820_s28 = smov 8   ;;  %vm495_vm4 = vcmask 80896  }
 0x1a8   : > { %698 = dma.vmem_to_hbm [thread:$0]  (%p899_p5), %s967_s16, 256, %s965_s21, %s971_s22, %s819_s23, %s819_s23, %s820_s28  }
 0x1a9   : > { %s305_s13 = scalar_lea.vmem %s1024_s7, %s650_s29 }
 0x26d   : > { %v488_v35 = vpop.f32.mrb[0].mxu1 }
 0x26e   : > { %496 = vst.msk [vmem:[%s305_s13] sm:$0xff] %vm495_vm4, %v488_v35  ;;  %v696_v36 = vpop.f32.mrb[1].mxu1 }
 0x26f   : > { %v491_v37 = vpop.f32.mrb[2].mxu1 }
 0x270   : > { %497 = vst.msk [vmem:[%s305_s13 + $0x8] sm:$0xff] %vm495_vm4, %v491_v37  ;;  %v697_v38 = vpop.f32.mrb[3].mxu1 }
 0x271 PF: > { %p704_p1 = scmp.ge.s32.totalorder %s814_s27, 2  ;;  %s545_s9 = sand.u32 1, %s802_s24  }
 0x272   : > { %s546_s11 = scalar_lea.sflag [#allocation3], %s545_s9 }
 0x273   : > { %p701_p5 = pnand %p704_p1, %p903_p6 }
 0x275   : > { %797 = dma.done.wait (!%p701_p5), %s546_s11, 256  }
 0x276   : > { %799 = vsyncadd (!%p701_p5), %s546_s11, 4294967040  ;;  %p18_p2 = scmp.ge.s32.totalorder %s886_s30, 4   ;;  %s1027_s24 = smov %s806_s25 }
 0x277   : > { %s1028_s25 = smov %s810_s26  ;;  %s1029_s26 = smov %s897_s10 }
 0x278   : > { %s1030_s27 = smov %s886_s30  ;;  %20 = sbr.rel (!%p18_p2) target bundleno = 3 (0x3), region = 99 }
 0x27f   :  { %567 = vsyncpa [#allocation3], 1 }
 0x280   :  { %569 = vsyncpa [#allocation3 + $0x1], 1 }

</bundles_post_ra>
